<compile_context>
chip_gen: v5e
topology: v5e:2x2
jax: 0.10.0
libtpu: 0.0.40
codegen_flags: <defaults>
</compile_context>

<pallas_src>
import jax
import jax.numpy as jnp
from jax.experimental import pallas as pl
from jax.experimental.pallas import tpu as pltpu


def _elu(h):
    # ELU(alpha=1): x if x > 0 else exp(x) - 1.  No clamp needed: the where
    # select discards the (possibly inf) unselected exp branch, benign in fwd.
    return jnp.where(h > 0.0, h, jnp.exp(h) - 1.0)


def _binary_decision_kernel(x_ref, w1_ref, wh_ref, b_ref, w5_ref, b5_ref, o_ref):
    cd = w1_ref.dtype  # MXU operand dtype (bf16 by default, f32 optional)

    # Layer 1: [tile_r, P*D_in] @ [P*D_in, P*H] (block-diag), f32 accumulation.
    x = x_ref[...].astype(cd)          # in-kernel cast -> no extra HBM pass
    h = jnp.dot(x, w1_ref[...], preferred_element_type=jnp.float32) + b_ref[0]
    h = _elu(h)

    # Hidden layers: stacked block-diag weights [n_hidden, P*H, P*H].
    for j in range(wh_ref.shape[0]):
        h = jnp.dot(h.astype(cd), wh_ref[j],
                    preferred_element_type=jnp.float32) + b_ref[j + 1]
        h = _elu(h)

    # Output layer: block-diag [P*H, P] -> one logit column per packed slot.
    z = jnp.dot(h.astype(cd), w5_ref[...],
                preferred_element_type=jnp.float32) + b5_ref[...]

    # sigmoid(z) = 1 / (1 + exp(-z)); reciprocal goes to the EUP (free slot).
    o_ref[...] = pl.reciprocal(1.0 + jnp.exp(-z), approx=True).astype(o_ref.dtype)


def _round_up(x, m):
    return (x + m - 1) // m * m


def _default_pack():
    # v6e/v7x MXU contraction is 256-wide -> pack 16 rows (K = 16*16 = 256).
    # v5e MXU is 128x128 -> pack 8 keeps a single MXU pass per push.
    try:
        kind = jax.devices()[0].device_kind.lower()
    except Exception:
        return 16
    if "v5 lite" in kind or "v5e" in kind or "v5lite" in kind:
        return 8
    return 16


def _auto_row_tile(R):
    """R = number of packed rows.  Target ~8 grid steps (both v7x TCs busy),
    keep each step >=64 packed rows (>=1024 batch rows) to amortize the
    ~0.35us/step overhead, cap at 512 packed rows (~1 MiB double-buffered x)."""
    if R <= 8:
        return R
    tile = _round_up(pl.cdiv(R, 8), 8)
    tile = max(tile, min(64, _round_up(pl.cdiv(R, 2), 8)))
    return min(tile, 512)


def pack_params(params, *, pack=None, weight_dtype=jnp.bfloat16):
    """Build block-diagonal, grid-resident parameters (done once)."""
    if pack is None:
        pack = _default_pack()
    eye = jnp.eye(pack, dtype=jnp.float32)
    n_hidden = params["w_hidden"].shape[0]
    w1bd = jnp.kron(eye, params["w1"]).astype(weight_dtype)              # [P*D, P*H]
    whbd = jnp.stack([jnp.kron(eye, params["w_hidden"][j])
                      for j in range(n_hidden)]).astype(weight_dtype)    # [nh, P*H, P*H]
    b_all = jnp.tile(params["b_all"], (1, 1, pack)).astype(jnp.float32)  # [nh+1, 1, P*H]
    w5bd = jnp.kron(eye, params["w5"]).astype(weight_dtype)              # [P*H, P]
    b5 = jnp.tile(params["b5"], (1, pack)).astype(jnp.float32)           # [1, P]
    return {"pack": int(pack), "w1bd": w1bd, "whbd": whbd,
            "b_all": b_all, "w5bd": w5bd, "b5": b5}


def binary_decision_forward(x, packed, *, row_tile=None):
    """x: [B, D_in] float32.  Returns [B, 1] float32 sigmoid probabilities."""
    B, D = x.shape
    P = packed["pack"]
    Din_p, H_p = packed["w1bd"].shape
    assert Din_p == P * D, "packed params do not match input feature dim"

    # Pad only to a multiple of the pack factor (copy only when B % P != 0).
    # Under an end-to-end jit this pad can fuse with the producer of x.
    B2 = _round_up(B, P)
    if B2 != B:
        x = jnp.pad(x, ((0, B2 - B), (0, 0)))
    R = B2 // P
    xp = x.reshape(R, P * D)   # free: contiguous row-major reshape, no data movement

    if row_tile is None:
        row_tile = _auto_row_tile(R)
    row_tile = int(row_tile)
    if row_tile >= R:
        row_tile = R
    elif row_tile % 8 != 0:
        row_tile = _round_up(row_tile, 8)

    grid = (pl.cdiv(R, row_tile),)   # ragged last block handled by Pallas masking

    in_specs = [
        pl.BlockSpec((row_tile, P * D), lambda i: (i, 0)),           # packed x tile
        pl.BlockSpec(packed["w1bd"].shape, lambda i: (0, 0)),        # resident weights
        pl.BlockSpec(packed["whbd"].shape, lambda i: (0, 0, 0)),
        pl.BlockSpec(packed["b_all"].shape, lambda i: (0, 0, 0)),
        pl.BlockSpec(packed["w5bd"].shape, lambda i: (0, 0)),
        pl.BlockSpec(packed["b5"].shape, lambda i: (0, 0)),
    ]
    out_spec = pl.BlockSpec((row_tile, P), lambda i: (i, 0))

    out = pl.pallas_call(
        _binary_decision_kernel,
        out_shape=jax.ShapeDtypeStruct((R, P), jnp.float32),
        grid_spec=pltpu.PrefetchScalarGridSpec(
            num_scalar_prefetch=0,
            grid=grid,
            in_specs=in_specs,
            out_specs=out_spec,
        ),
        compiler_params=pltpu.CompilerParams(
            dimension_semantics=("parallel",)),
    )(xp, packed["w1bd"], packed["whbd"], packed["b_all"],
      packed["w5bd"], packed["b5"])

    # out[r, j] is the probability for original row r*P + j (row-major) -> [B, 1].
    return out.reshape(B2, 1)[:B]


def init_params(key, n_channels, n_clusters, n_hidden_dim, n_hidden_layers=3):
    """PyTorch-style Linear init: U(-1/sqrt(fan_in), 1/sqrt(fan_in)).
    Weights stored as [in_features, out_features]; hidden layers stacked."""
    d_in = n_channels * 2 + n_clusters
    H = n_hidden_dim

    def linear(k, fan_in, fan_out):
        kw, kb = jax.random.split(k)
        bound = 1.0 / (fan_in ** 0.5)
        w = jax.random.uniform(kw, (fan_in, fan_out), jnp.float32, -bound, bound)
        b = jax.random.uniform(kb, (fan_out,), jnp.float32, -bound, bound)
        return w, b

    keys = jax.random.split(key, n_hidden_layers + 2)
    w1, b1 = linear(keys[0], d_in, H)
    whs, bhs = [], []
    for j in range(n_hidden_layers):
        w, b = linear(keys[1 + j], H, H)
        whs.append(w)
        bhs.append(b)
    w5, b5 = linear(keys[n_hidden_layers + 1], H, 1)

    return {
        "w1": w1,                                       # [d_in, H]
        "w_hidden": jnp.stack(whs),                     # [nh, H, H]
        "b_all": jnp.stack([b1] + bhs)[:, None, :],     # [nh+1, 1, H]
        "w5": w5,                                       # [H, 1]
        "b5": b5.reshape(1, 1),                         # [1, 1]
    }


def binary_decision_ref(x, params):
    h = jax.nn.elu(x @ params["w1"] + params["b_all"][0])
    for j in range(params["w_hidden"].shape[0]):
        h = jax.nn.elu(h @ params["w_hidden"][j] + params["b_all"][j + 1])
    z = h @ params["w5"] + params["b5"]
    return jax.nn.sigmoid(z)


if __name__ == "__main__":
    n_channels, n_clusters, n_hidden_dim = 4, 8, 16
    d_in = n_channels * 2 + n_clusters   # = 16

    key = jax.random.PRNGKey(0)
    key, kx1, kx2 = jax.random.split(key, 3)
    params = init_params(key, n_channels, n_clusters, n_hidden_dim)

    # 1) Small batch, f32 MXU operands (tight tolerance), pack=16 -> single block.
    packed_f32 = pack_params(params, pack=16, weight_dtype=jnp.float32)
    x_small = jax.random.normal(kx1, (16, d_in), jnp.float32)
    out_small = jax.block_until_ready(binary_decision_forward(x_small, packed_f32))
    ref_small = binary_decision_ref(x_small, params)
    assert out_small.shape == (16, 1)
    assert jnp.allclose(out_small, ref_small, atol=5e-3, rtol=5e-3), "f32 small mismatch"

    # 2) Larger, non-pack-multiple batch; default bf16 MXU operands, auto pack/tile,
    #    ragged last grid block, lane-packed compute.
    packed = pack_params(params)
    x_big = jax.random.normal(kx2, (1000, d_in), jnp.float32)
    out_big = jax.block_until_ready(binary_decision_forward(x_big, packed))
    ref_big = binary_decision_ref(x_big, params)
    assert out_big.shape == (1000, 1)
    assert jnp.allclose(out_big, ref_big, atol=2e-2, rtol=2e-2), "bf16 big mismatch"

    # 3) Explicit small row tile -> multi-step grid exercised.
    out_big2 = jax.block_until_ready(
        binary_decision_forward(x_big, packed, row_tile=16))
    assert jnp.allclose(out_big2, ref_big, atol=2e-2, rtol=2e-2), "multi-step mismatch"

    print("KERNEL_OK")
</pallas_src>

<mosaic_0001>
module attributes {stable_mosaic.version = 11 : i64} {
  func.func @_binary_decision_kernel(%arg0: i32, %arg1: memref<1x256xf32, #tpu.memory_space<vmem>>, %arg2: memref<256x256xf32, #tpu.memory_space<vmem>>, %arg3: memref<3x256x256xf32, #tpu.memory_space<vmem>>, %arg4: memref<4x1x256xf32, #tpu.memory_space<vmem>>, %arg5: memref<256x16xf32, #tpu.memory_space<vmem>>, %arg6: memref<1x16xf32, #tpu.memory_space<vmem>>, %arg7: memref<1x16xf32, #tpu.memory_space<vmem>>) attributes {dimension_semantics = [#tpu.dimension_semantics<parallel>], iteration_bounds = array<i64: 1>, scalar_prefetch = 0 : i64, scratch_operands = 0 : i64, tpu.core_type = #tpu.core_type<tc>, window_params = [{transform_indices = @transform_0, window_bounds = array<i64: 1, 256>}, {pipeline_mode = #tpu.pipeline_mode<synchronous>, transform_indices = @transform_1, window_bounds = array<i64: 256, 256>}, {pipeline_mode = #tpu.pipeline_mode<synchronous>, transform_indices = @transform_2, window_bounds = array<i64: 3, 256, 256>}, {pipeline_mode = #tpu.pipeline_mode<synchronous>, transform_indices = @transform_3, window_bounds = array<i64: 4, 1, 256>}, {pipeline_mode = #tpu.pipeline_mode<synchronous>, transform_indices = @transform_4, window_bounds = array<i64: 256, 16>}, {pipeline_mode = #tpu.pipeline_mode<synchronous>, transform_indices = @transform_5, window_bounds = array<i64: 1, 16>}, {transform_indices = @transform_6, window_bounds = array<i64: 1, 16>}]} {
    %c0 = arith.constant 0 : index
    %c0_0 = arith.constant 0 : index
    %0 = vector.load %arg1[%c0, %c0_0] : memref<1x256xf32, #tpu.memory_space<vmem>>, vector<1x256xf32>
    %c0_1 = arith.constant 0 : index
    %c0_2 = arith.constant 0 : index
    %1 = vector.load %arg2[%c0_1, %c0_2] : memref<256x256xf32, #tpu.memory_space<vmem>>, vector<256x256xf32>
    %cst = arith.constant dense<0.000000e+00> : vector<1x256xf32>
    %2 = tpu.matmul %0, %1, %cst {dimension_numbers = #tpu.dot_dimension_numbers<[1], [0], [0], [1], [0, 0, 1, 1], [], []>} : vector<1x256xf32>, vector<256x256xf32>, vector<1x256xf32> -> vector<1x256xf32>
    %c0_3 = arith.constant 0 : index
    %c0_4 = arith.constant 0 : index
    %c0_5 = arith.constant 0 : index
    %3 = vector.load %arg4[%c0_3, %c0_4, %c0_5] : memref<4x1x256xf32, #tpu.memory_space<vmem>>, vector<1x1x256xf32>
    %4 = vector.shape_cast %3 : vector<1x1x256xf32> to vector<1x256xf32>
    %5 = arith.addf %2, %4 : vector<1x256xf32>
    %cst_6 = arith.constant 0.000000e+00 : f32
    %6 = vector.broadcast %cst_6 : f32 to vector<1x256xf32>
    %7 = arith.cmpf ogt, %5, %6 : vector<1x256xf32>
    %8 = math.exp %5 : vector<1x256xf32>
    %cst_7 = arith.constant 1.000000e+00 : f32
    %9 = vector.broadcast %cst_7 : f32 to vector<1x256xf32>
    %10 = arith.subf %8, %9 : vector<1x256xf32>
    %11 = arith.select %7, %5, %10 : vector<1x256xi1>, vector<1x256xf32>
    %c0_8 = arith.constant 0 : index
    %c0_9 = arith.constant 0 : index
    %c0_10 = arith.constant 0 : index
    %12 = vector.load %arg3[%c0_8, %c0_9, %c0_10] : memref<3x256x256xf32, #tpu.memory_space<vmem>>, vector<1x256x256xf32>
    %13 = vector.shape_cast %12 : vector<1x256x256xf32> to vector<256x256xf32>
    %cst_11 = arith.constant dense<0.000000e+00> : vector<1x256xf32>
    %14 = tpu.matmul %11, %13, %cst_11 {dimension_numbers = #tpu.dot_dimension_numbers<[1], [0], [0], [1], [0, 0, 1, 1], [], []>} : vector<1x256xf32>, vector<256x256xf32>, vector<1x256xf32> -> vector<1x256xf32>
    %c1 = arith.constant 1 : index
    %c0_12 = arith.constant 0 : index
    %c0_13 = arith.constant 0 : index
    %15 = vector.load %arg4[%c1, %c0_12, %c0_13] : memref<4x1x256xf32, #tpu.memory_space<vmem>>, vector<1x1x256xf32>
    %16 = vector.shape_cast %15 : vector<1x1x256xf32> to vector<1x256xf32>
    %17 = arith.addf %14, %16 : vector<1x256xf32>
    %cst_14 = arith.constant 0.000000e+00 : f32
    %18 = vector.broadcast %cst_14 : f32 to vector<1x256xf32>
    %19 = arith.cmpf ogt, %17, %18 : vector<1x256xf32>
    %20 = math.exp %17 : vector<1x256xf32>
    %cst_15 = arith.constant 1.000000e+00 : f32
    %21 = vector.broadcast %cst_15 : f32 to vector<1x256xf32>
    %22 = arith.subf %20, %21 : vector<1x256xf32>
    %23 = arith.select %19, %17, %22 : vector<1x256xi1>, vector<1x256xf32>
    %c1_16 = arith.constant 1 : index
    %c0_17 = arith.constant 0 : index
    %c0_18 = arith.constant 0 : index
    %24 = vector.load %arg3[%c1_16, %c0_17, %c0_18] : memref<3x256x256xf32, #tpu.memory_space<vmem>>, vector<1x256x256xf32>
    %25 = vector.shape_cast %24 : vector<1x256x256xf32> to vector<256x256xf32>
    %cst_19 = arith.constant dense<0.000000e+00> : vector<1x256xf32>
    %26 = tpu.matmul %23, %25, %cst_19 {dimension_numbers = #tpu.dot_dimension_numbers<[1], [0], [0], [1], [0, 0, 1, 1], [], []>} : vector<1x256xf32>, vector<256x256xf32>, vector<1x256xf32> -> vector<1x256xf32>
    %c2 = arith.constant 2 : index
    %c0_20 = arith.constant 0 : index
    %c0_21 = arith.constant 0 : index
    %27 = vector.load %arg4[%c2, %c0_20, %c0_21] : memref<4x1x256xf32, #tpu.memory_space<vmem>>, vector<1x1x256xf32>
    %28 = vector.shape_cast %27 : vector<1x1x256xf32> to vector<1x256xf32>
    %29 = arith.addf %26, %28 : vector<1x256xf32>
    %cst_22 = arith.constant 0.000000e+00 : f32
    %30 = vector.broadcast %cst_22 : f32 to vector<1x256xf32>
    %31 = arith.cmpf ogt, %29, %30 : vector<1x256xf32>
    %32 = math.exp %29 : vector<1x256xf32>
    %cst_23 = arith.constant 1.000000e+00 : f32
    %33 = vector.broadcast %cst_23 : f32 to vector<1x256xf32>
    %34 = arith.subf %32, %33 : vector<1x256xf32>
    %35 = arith.select %31, %29, %34 : vector<1x256xi1>, vector<1x256xf32>
    %c2_24 = arith.constant 2 : index
    %c0_25 = arith.constant 0 : index
    %c0_26 = arith.constant 0 : index
    %36 = vector.load %arg3[%c2_24, %c0_25, %c0_26] : memref<3x256x256xf32, #tpu.memory_space<vmem>>, vector<1x256x256xf32>
    %37 = vector.shape_cast %36 : vector<1x256x256xf32> to vector<256x256xf32>
    %cst_27 = arith.constant dense<0.000000e+00> : vector<1x256xf32>
    %38 = tpu.matmul %35, %37, %cst_27 {dimension_numbers = #tpu.dot_dimension_numbers<[1], [0], [0], [1], [0, 0, 1, 1], [], []>} : vector<1x256xf32>, vector<256x256xf32>, vector<1x256xf32> -> vector<1x256xf32>
    %c3 = arith.constant 3 : index
    %c0_28 = arith.constant 0 : index
    %c0_29 = arith.constant 0 : index
    %39 = vector.load %arg4[%c3, %c0_28, %c0_29] : memref<4x1x256xf32, #tpu.memory_space<vmem>>, vector<1x1x256xf32>
    %40 = vector.shape_cast %39 : vector<1x1x256xf32> to vector<1x256xf32>
    %41 = arith.addf %38, %40 : vector<1x256xf32>
    %cst_30 = arith.constant 0.000000e+00 : f32
    %42 = vector.broadcast %cst_30 : f32 to vector<1x256xf32>
    %43 = arith.cmpf ogt, %41, %42 : vector<1x256xf32>
    %44 = math.exp %41 : vector<1x256xf32>
    %cst_31 = arith.constant 1.000000e+00 : f32
    %45 = vector.broadcast %cst_31 : f32 to vector<1x256xf32>
    %46 = arith.subf %44, %45 : vector<1x256xf32>
    %47 = arith.select %43, %41, %46 : vector<1x256xi1>, vector<1x256xf32>
    %c0_32 = arith.constant 0 : index
    %c0_33 = arith.constant 0 : index
    %48 = vector.load %arg5[%c0_32, %c0_33] : memref<256x16xf32, #tpu.memory_space<vmem>>, vector<256x16xf32>
    %cst_34 = arith.constant dense<0.000000e+00> : vector<1x16xf32>
    %49 = tpu.matmul %47, %48, %cst_34 {dimension_numbers = #tpu.dot_dimension_numbers<[1], [0], [0], [1], [0, 0, 1, 1], [], []>} : vector<1x256xf32>, vector<256x16xf32>, vector<1x16xf32> -> vector<1x16xf32>
    %c0_35 = arith.constant 0 : index
    %c0_36 = arith.constant 0 : index
    %50 = vector.load %arg6[%c0_35, %c0_36] : memref<1x16xf32, #tpu.memory_space<vmem>>, vector<1x16xf32>
    %51 = arith.addf %49, %50 : vector<1x16xf32>
    %cst_37 = arith.constant 0.000000e+00 : f32
    %52 = vector.broadcast %cst_37 : f32 to vector<1x16xf32>
    %53 = arith.subf %52, %51 : vector<1x16xf32>
    %54 = math.exp %53 : vector<1x16xf32>
    %cst_38 = arith.constant 1.000000e+00 : f32
    %55 = vector.broadcast %cst_38 : f32 to vector<1x16xf32>
    %56 = arith.addf %55, %54 : vector<1x16xf32>
    %57 = tpu.reciprocal %56 {approx = true} : vector<1x16xf32> -> vector<1x16xf32>
    %c0_39 = arith.constant 0 : index
    %c0_40 = arith.constant 0 : index
    %58 = vector.load %arg7[%c0_39, %c0_40] : memref<1x16xf32, #tpu.memory_space<vmem>>, vector<1x16xf32>
    tpu.vector_store %arg7[%c0_39, %c0_40], %57 {strides = array<i32>} : memref<1x16xf32, #tpu.memory_space<vmem>>, vector<1x16xf32>,
    return
  }
  func.func @transform_0(%arg0: i32) -> (i32, i32) {
    %c0_i32 = arith.constant 0 : i32
    %c0_i32_0 = arith.constant 0 : i32
    return %arg0, %c0_i32 : i32, i32
  }
  func.func @transform_1(%arg0: i32) -> (i32, i32) {
    %c0_i32 = arith.constant 0 : i32
    %c0_i32_0 = arith.constant 0 : i32
    %c0_i32_1 = arith.constant 0 : i32
    return %c0_i32, %c0_i32_0 : i32, i32
  }
  func.func @transform_2(%arg0: i32) -> (i32, i32, i32) {
    %c0_i32 = arith.constant 0 : i32
    %c0_i32_0 = arith.constant 0 : i32
    %c0_i32_1 = arith.constant 0 : i32
    %c0_i32_2 = arith.constant 0 : i32
    return %c0_i32, %c0_i32_0, %c0_i32_1 : i32, i32, i32
  }
  func.func @transform_3(%arg0: i32) -> (i32, i32, i32) {
    %c0_i32 = arith.constant 0 : i32
    %c0_i32_0 = arith.constant 0 : i32
    %c0_i32_1 = arith.constant 0 : i32
    %c0_i32_2 = arith.constant 0 : i32
    return %c0_i32, %c0_i32_0, %c0_i32_1 : i32, i32, i32
  }
  func.func @transform_4(%arg0: i32) -> (i32, i32) {
    %c0_i32 = arith.constant 0 : i32
    %c0_i32_0 = arith.constant 0 : i32
    %c0_i32_1 = arith.constant 0 : i32
    return %c0_i32, %c0_i32_0 : i32, i32
  }
  func.func @transform_5(%arg0: i32) -> (i32, i32) {
    %c0_i32 = arith.constant 0 : i32
    %c0_i32_0 = arith.constant 0 : i32
    %c0_i32_1 = arith.constant 0 : i32
    return %c0_i32, %c0_i32_0 : i32, i32
  }
  func.func @transform_6(%arg0: i32) -> (i32, i32) {
    %c0_i32 = arith.constant 0 : i32
    %c0_i32_0 = arith.constant 0 : i32
    return %arg0, %c0_i32 : i32, i32
  }
}

</mosaic_0001>

<bundles_post_ra>
// kernel: tpu_custom_call.1
= control target key start
LH: loop header
LB: loop body
LE: loop exit
PB: predicated region body
PF: predicated region fallthrough
CT: control target
= control target key end

     0   :  { %11 = vsyncpa [#allocation3], 0  ;;  %s1082_s0 = inlined_call_operand.vmem [shape: f32[1,256], index: 0, kind: input, shape index: {}]   ;;  %s1083_s1 = inlined_call_operand.hbm [shape: f32[256,256], index: 1, kind: input, shape index: {}]   ;;  %s1084_s2 = inlined_call_operand.hbm [shape: f32[3,256,256], index: 2, kind: input, shape index: {}]   ;;  %s1085_s3 = inlined_call_operand.vmem [shape: f32[4,1,256], index: 3, kind: input, shape index: {}]   ;;  %s1086_s4 = inlined_call_operand.vmem [shape: f32[256,16], index: 4, kind: input, shape index: {}]   ;;  %s1087_s5 = inlined_call_operand.vmem [shape: f32[1,16], index: 5, kind: input, shape index: {}]   ;;  %s1088_s6 = inlined_call_operand.hbm [shape: f32[1,16], index: 6, kind: output, shape index: {}]  }
   0x1   :  { %12 = vsyncpa [#allocation6], 0 }
   0x2   :  { %13 = vsyncpa [#allocation4], 0  ;;  %s20_s23 = sshll.u32 %s1083_s1, 4  ;;  %s919_s24 = smov [#allocation2]   ;;  %s21_s23 = int_to_ptr.hbm [resolvable:$true] %s20_s23 }
   0x3   :  { %s22_s25 = sshll.u32 %s919_s24, 4  ;;  %s33_s28 = sshll.u32 %s1084_s2, 4  ;;  %s23_s25 = int_to_ptr.vmem [resolvable:$true] %s22_s25  ;;  %s34_s28 = int_to_ptr.hbm [resolvable:$true] %s33_s28 }
   0x4   :  { %s920_s29 = smov 256   ;;  %s921_s30 = smov 16  }
   0x5   :  { %28 = dma.hbm_to_vmem [thread:$0]  %s21_s23, 8192, %s23_s25, [#allocation3], %s920_s29, %s920_s29, %s921_s30  }
   0x6   :  { %s922_s7 = smov [#allocation5]  }
   0x7   :  { %s35_s8 = sshll.u32 %s922_s7, 4  ;;  %s36_s8 = int_to_ptr.vmem [resolvable:$true] %s35_s8 }
   0x8   :  { %41 = dma.hbm_to_vmem [thread:$0]  %s34_s28, 24576, %s36_s8, [#allocation6], %s920_s29, %s920_s29, %s921_s30  }
   0x9   :  { %913 = dma.done.wait [#allocation3], 8192  }
   0xa   :  { %914 = vsyncadd [#allocation3], 4294959104 }
   0xb   :  { %915 = dma.done.wait [#allocation6], 24576  }
   0xc   :  { %916 = vsyncadd [#allocation6], 4294942720  ;;  %v87_v0 = vld [vmem:[#allocation2 + $0xf0] sm:$0xff]  ;;  %v88_v1 = vld [vmem:[#allocation2 + $0xf8] sm:$0xff]  ;;  %s923_s26 = smov [#allocation7]   ;;  %s794_s30 = sshll.u32 %s1088_s6, 4  ;;  %s795_s30 = int_to_ptr.hbm [resolvable:$true] %s794_s30 }
   0xd   :  { %v85_v2 = vld [vmem:[#allocation2 + $0xe0] sm:$0xff]  ;;  %132 = vmatpush.msra.mxu0 %v87_v0  ;;  %172 = vmatpush.msra.mxu2 %v88_v1  ;;  %v119_v3 = vld [vmem:[#allocation2 + $0x1f0] sm:$0xff]  ;;  %v86_v4 = vld [vmem:[#allocation2 + $0xe8] sm:$0xff]  ;;  %s792_s27 = sshll.u32 %s923_s26, 4  ;;  %vm785_vm8 = vcmask 122880   ;;  %s793_s27 = int_to_ptr.vmem [resolvable:$true] %s792_s27 }
   0xe   :  { %v120_v5 = vld [vmem:[#allocation2 + $0x1f8] sm:$0xff]  ;;  %152 = vmatpush.msra.mxu1 %v119_v3  ;;  %v83_v6 = vld [vmem:[#allocation2 + $0xd0] sm:$0xff]  ;;  %v117_v7 = vld [vmem:[#allocation2 + $0x1e0] sm:$0xff] }
   0xf   :  { %192 = vmatpush.msra.mxu3 %v120_v5  ;;  %v84_v8 = vld [vmem:[#allocation2 + $0xd8] sm:$0xff]  ;;  %133 = vmatpush.msra.mxu0 %v85_v2  ;;  %v118_v9 = vld [vmem:[#allocation2 + $0x1e8] sm:$0xff]  ;;  %v115_v10 = vld [vmem:[#allocation2 + $0x1d0] sm:$0xff] }
  0x10   :  { %173 = vmatpush.msra.mxu2 %v86_v4  ;;  %153 = vmatpush.msra.mxu1 %v117_v7  ;;  %v81_v11 = vld [vmem:[#allocation2 + $0xc0] sm:$0xff]  ;;  %v82_v12 = vld [vmem:[#allocation2 + $0xc8] sm:$0xff]  ;;  %v116_v13 = vld [vmem:[#allocation2 + $0x1d8] sm:$0xff] }
  0x11   :  { %193 = vmatpush.msra.mxu3 %v118_v9  ;;  %134 = vmatpush.msra.mxu0 %v83_v6  ;;  %v113_v14 = vld [vmem:[#allocation2 + $0x1c0] sm:$0xff]  ;;  %v114_v15 = vld [vmem:[#allocation2 + $0x1c8] sm:$0xff]  ;;  %v79_v16 = vld [vmem:[#allocation2 + $0xb0] sm:$0xff] }
  0x12   :  { %174 = vmatpush.msra.mxu2 %v84_v8  ;;  %154 = vmatpush.msra.mxu1 %v115_v10  ;;  %v80_v17 = vld [vmem:[#allocation2 + $0xb8] sm:$0xff]  ;;  %v111_v18 = vld [vmem:[#allocation2 + $0x1b0] sm:$0xff]  ;;  %v77_v20 = vld [vmem:[#allocation2 + $0xa0] sm:$0xff] }
  0x13   :  { %194 = vmatpush.msra.mxu3 %v116_v13  ;;  %135 = vmatpush.msra.mxu0 %v81_v11  ;;  %v112_v19 = vld [vmem:[#allocation2 + $0x1b8] sm:$0xff]  ;;  %v78_v21 = vld [vmem:[#allocation2 + $0xa8] sm:$0xff]  ;;  %v109_v22 = vld [vmem:[#allocation2 + $0x1a0] sm:$0xff] }
  0x14   :  { %175 = vmatpush.msra.mxu2 %v82_v12  ;;  %155 = vmatpush.msra.mxu1 %v113_v14  ;;  %v110_v23 = vld [vmem:[#allocation2 + $0x1a8] sm:$0xff]  ;;  %v75_v24 = vld [vmem:[#allocation2 + $0x90] sm:$0xff]  ;;  %v76_v25 = vld [vmem:[#allocation2 + $0x98] sm:$0xff] }
  0x15   :  { %195 = vmatpush.msra.mxu3 %v114_v15  ;;  %136 = vmatpush.msra.mxu0 %v79_v16  ;;  %v107_v26 = vld [vmem:[#allocation2 + $0x190] sm:$0xff]  ;;  %v108_v27 = vld [vmem:[#allocation2 + $0x198] sm:$0xff]  ;;  %v73_v28 = vld [vmem:[#allocation2 + $0x80] sm:$0xff] }
  0x16   :  { %176 = vmatpush.msra.mxu2 %v80_v17  ;;  %156 = vmatpush.msra.mxu1 %v111_v18  ;;  %v74_v29 = vld [vmem:[#allocation2 + $0x88] sm:$0xff]  ;;  %v105_v30 = vld [vmem:[#allocation2 + $0x180] sm:$0xff]  ;;  %v71_v32 = vld [vmem:[#allocation2 + $0x70] sm:$0xff] }
  0x17   :  { %196 = vmatpush.msra.mxu3 %v112_v19  ;;  %137 = vmatpush.msra.mxu0 %v77_v20  ;;  %v106_v31 = vld [vmem:[#allocation2 + $0x188] sm:$0xff]  ;;  %v72_v33 = vld [vmem:[#allocation2 + $0x78] sm:$0xff]  ;;  %v103_v34 = vld [vmem:[#allocation2 + $0x170] sm:$0xff] }
  0x18   :  { %177 = vmatpush.msra.mxu2 %v78_v21  ;;  %157 = vmatpush.msra.mxu1 %v109_v22  ;;  %v104_v35 = vld [vmem:[#allocation2 + $0x178] sm:$0xff]  ;;  %v69_v36 = vld [vmem:[#allocation2 + $0x60] sm:$0xff]  ;;  %v70_v37 = vld [vmem:[#allocation2 + $0x68] sm:$0xff] }
  0x19   :  { %197 = vmatpush.msra.mxu3 %v110_v23  ;;  %138 = vmatpush.msra.mxu0 %v75_v24  ;;  %v101_v38 = vld [vmem:[#allocation2 + $0x160] sm:$0xff]  ;;  %v102_v39 = vld [vmem:[#allocation2 + $0x168] sm:$0xff]  ;;  %v67_v40 = vld [vmem:[#allocation2 + $0x50] sm:$0xff] }
  0x1a   :  { %178 = vmatpush.msra.mxu2 %v76_v25  ;;  %158 = vmatpush.msra.mxu1 %v107_v26  ;;  %v68_v41 = vld [vmem:[#allocation2 + $0x58] sm:$0xff]  ;;  %v99_v42 = vld [vmem:[#allocation2 + $0x150] sm:$0xff]  ;;  %v65_v44 = vld [vmem:[#allocation2 + $0x40] sm:$0xff] }
  0x1b   :  { %198 = vmatpush.msra.mxu3 %v108_v27  ;;  %139 = vmatpush.msra.mxu0 %v73_v28  ;;  %v100_v43 = vld [vmem:[#allocation2 + $0x158] sm:$0xff]  ;;  %v66_v45 = vld [vmem:[#allocation2 + $0x48] sm:$0xff]  ;;  %v97_v46 = vld [vmem:[#allocation2 + $0x140] sm:$0xff] }
  0x1c   :  { %179 = vmatpush.msra.mxu2 %v74_v29  ;;  %159 = vmatpush.msra.mxu1 %v105_v30  ;;  %v98_v47 = vld [vmem:[#allocation2 + $0x148] sm:$0xff]  ;;  %v63_v48 = vld [vmem:[#allocation2 + $0x30] sm:$0xff]  ;;  %v64_v49 = vld [vmem:[#allocation2 + $0x38] sm:$0xff] }
  0x1d   :  { %199 = vmatpush.msra.mxu3 %v106_v31  ;;  %140 = vmatpush.msra.mxu0 %v71_v32  ;;  %v95_v50 = vld [vmem:[#allocation2 + $0x130] sm:$0xff]  ;;  %v96_v51 = vld [vmem:[#allocation2 + $0x138] sm:$0xff]  ;;  %v61_v52 = vld [vmem:[#allocation2 + $0x20] sm:$0xff] }
  0x1e   :  { %180 = vmatpush.msra.mxu2 %v72_v33  ;;  %160 = vmatpush.msra.mxu1 %v103_v34  ;;  %v62_v53 = vld [vmem:[#allocation2 + $0x28] sm:$0xff]  ;;  %v93_v54 = vld [vmem:[#allocation2 + $0x120] sm:$0xff]  ;;  %v59_v57 = vld [vmem:[#allocation2 + $0x10] sm:$0xff] }
  0x1f   :  { %200 = vmatpush.msra.mxu3 %v104_v35  ;;  %141 = vmatpush.msra.mxu0 %v69_v36  ;;  %v94_v55 = vld [vmem:[#allocation2 + $0x128] sm:$0xff]  ;;  %v56_v56 = vld [vmem:[%s1082_s0] sm:$0x3]  ;;  %v60_v58 = vld [vmem:[#allocation2 + $0x18] sm:$0xff] }
  0x20   :  { %181 = vmatpush.msra.mxu2 %v70_v37  ;;  %161 = vmatpush.msra.mxu1 %v101_v38  ;;  %v91_v59 = vld [vmem:[#allocation2 + $0x110] sm:$0xff]  ;;  %v92_v60 = vld [vmem:[#allocation2 + $0x118] sm:$0xff]  ;;  %v57_v61 = vld [vmem:[#allocation2] sm:$0xff]  ;;  %v123_v63 = vperm.slane %v56_v56, 0  ;;  %v124_v2 = vperm.slane %v56_v56, 1 }
  0x21   :  { %201 = vmatpush.msra.mxu3 %v102_v39  ;;  %142 = vmatpush.msra.mxu0 %v67_v40  ;;  %v58_v62 = vld [vmem:[#allocation2 + $0x8] sm:$0xff]  ;;  %v89_v0 = vld [vmem:[#allocation2 + $0x100] sm:$0xff]  ;;  %v252_v3 = vld [vmem:[#allocation5 + $0xf0] sm:$0xff] }
  0x22   :  { %182 = vmatpush.msra.mxu2 %v68_v41  ;;  %162 = vmatpush.msra.mxu1 %v99_v42  ;;  %v90_v1 = vld [vmem:[#allocation2 + $0x108] sm:$0xff]  ;;  %v253_v4 = vld [vmem:[#allocation5 + $0xf8] sm:$0xff]  ;;  %v284_v5 = vld [vmem:[#allocation5 + $0x1f0] sm:$0xff] }
  0x23   :  { %202 = vmatpush.msra.mxu3 %v100_v43  ;;  %143 = vmatpush.msra.mxu0 %v65_v44  ;;  %v285_v6 = vld [vmem:[#allocation5 + $0x1f8] sm:$0xff]  ;;  %v250_v7 = vld [vmem:[#allocation5 + $0xe0] sm:$0xff]  ;;  %v251_v8 = vld [vmem:[#allocation5 + $0xe8] sm:$0xff] }
  0x24   :  { %183 = vmatpush.msra.mxu2 %v66_v45  ;;  %163 = vmatpush.msra.mxu1 %v97_v46  ;;  %v282_v9 = vld [vmem:[#allocation5 + $0x1e0] sm:$0xff]  ;;  %v283_v10 = vld [vmem:[#allocation5 + $0x1e8] sm:$0xff]  ;;  %v248_v11 = vld [vmem:[#allocation5 + $0xd0] sm:$0xff] }
  0x25   :  { %203 = vmatpush.msra.mxu3 %v98_v47  ;;  %144 = vmatpush.msra.mxu0 %v63_v48  ;;  %v249_v12 = vld [vmem:[#allocation5 + $0xd8] sm:$0xff]  ;;  %v280_v13 = vld [vmem:[#allocation5 + $0x1d0] sm:$0xff]  ;;  %v246_v15 = vld [vmem:[#allocation5 + $0xc0] sm:$0xff] }
  0x26   :  { %184 = vmatpush.msra.mxu2 %v64_v49  ;;  %164 = vmatpush.msra.mxu1 %v95_v50  ;;  %v281_v14 = vld [vmem:[#allocation5 + $0x1d8] sm:$0xff]  ;;  %v247_v16 = vld [vmem:[#allocation5 + $0xc8] sm:$0xff]  ;;  %v278_v17 = vld [vmem:[#allocation5 + $0x1c0] sm:$0xff] }
  0x27   :  { %204 = vmatpush.msra.mxu3 %v96_v51  ;;  %145 = vmatpush.msra.mxu0 %v61_v52  ;;  %v279_v18 = vld [vmem:[#allocation5 + $0x1c8] sm:$0xff]  ;;  %v244_v19 = vld [vmem:[#allocation5 + $0xb0] sm:$0xff]  ;;  %v245_v20 = vld [vmem:[#allocation5 + $0xb8] sm:$0xff] }
  0x28   :  { %185 = vmatpush.msra.mxu2 %v62_v53  ;;  %165 = vmatpush.msra.mxu1 %v93_v54  ;;  %v242_v21 = vld [vmem:[#allocation5 + $0xa0] sm:$0xff]  ;;  %v243_v22 = vld [vmem:[#allocation5 + $0xa8] sm:$0xff]  ;;  %v240_v23 = vld [vmem:[#allocation5 + $0x90] sm:$0xff] }
  0x29   :  { %205 = vmatpush.msra.mxu3 %v94_v55  ;;  %146 = vmatpush.msra.mxu0 %v59_v57  ;;  %v241_v24 = vld [vmem:[#allocation5 + $0x98] sm:$0xff]  ;;  %v238_v25 = vld [vmem:[#allocation5 + $0x80] sm:$0xff]  ;;  %v276_v26 = vld [vmem:[#allocation5 + $0x1b0] sm:$0xff] }
  0x2a   :  { %186 = vmatpush.msra.mxu2 %v60_v58  ;;  %166 = vmatpush.msra.mxu1 %v91_v59  ;;  %v239_v27 = vld [vmem:[#allocation5 + $0x88] sm:$0xff]  ;;  %v277_v28 = vld [vmem:[#allocation5 + $0x1b8] sm:$0xff]  ;;  %v236_v29 = vld [vmem:[#allocation5 + $0x70] sm:$0xff] }
  0x2b   :  { %206 = vmatpush.msra.mxu3 %v92_v60  ;;  %147 = vmatpush.msra.mxu0 %v57_v61  ;;  %v274_v30 = vld [vmem:[#allocation5 + $0x1a0] sm:$0xff]  ;;  %v237_v31 = vld [vmem:[#allocation5 + $0x78] sm:$0xff]  ;;  %v275_v32 = vld [vmem:[#allocation5 + $0x1a8] sm:$0xff] }
  0x2c   :  { %187 = vmatpush.msra.mxu2 %v58_v62  ;;  %148 = vmatmul.f32.vlgmr.msra.gmra.mxu0 %v123_v63  ;;  %v234_v33 = vld [vmem:[#allocation5 + $0x60] sm:$0xff]  ;;  %v272_v34 = vld [vmem:[#allocation5 + $0x190] sm:$0xff]  ;;  %v235_v35 = vld [vmem:[#allocation5 + $0x68] sm:$0xff] }
  0x2d   :  { %188 = vmatmul.f32.vlgmr.msra.gmra.mxu2 %v123_v63  ;;  %167 = vmatpush.msra.mxu1 %v89_v0  ;;  %v273_v36 = vld [vmem:[#allocation5 + $0x198] sm:$0xff]  ;;  %v232_v37 = vld [vmem:[#allocation5 + $0x50] sm:$0xff]  ;;  %v270_v38 = vld [vmem:[#allocation5 + $0x180] sm:$0xff] }
  0x2e   :  { %207 = vmatpush.msra.mxu3 %v90_v1  ;;  %168 = vmatmul.f32.vlgmr.msra.gmra.mxu1 %v124_v2  ;;  %v233_v39 = vld [vmem:[#allocation5 + $0x58] sm:$0xff]  ;;  %v271_v40 = vld [vmem:[#allocation5 + $0x188] sm:$0xff]  ;;  %v230_v41 = vld [vmem:[#allocation5 + $0x40] sm:$0xff] }
  0x2f   :  { %208 = vmatmul.f32.vlgmr.msra.gmra.mxu3 %v124_v2  ;;  %293 = vmatpush.msrb.mxu0 %v252_v3  ;;  %v268_v42 = vld [vmem:[#allocation5 + $0x170] sm:$0xff]  ;;  %v231_v43 = vld [vmem:[#allocation5 + $0x48] sm:$0xff]  ;;  %v269_v44 = vld [vmem:[#allocation5 + $0x178] sm:$0xff] }
  0x30   :  { %333 = vmatpush.msrb.mxu2 %v253_v4  ;;  %313 = vmatpush.msrb.mxu1 %v284_v5  ;;  %v228_v45 = vld [vmem:[#allocation5 + $0x30] sm:$0xff]  ;;  %v266_v46 = vld [vmem:[#allocation5 + $0x160] sm:$0xff]  ;;  %v229_v47 = vld [vmem:[#allocation5 + $0x38] sm:$0xff] }
  0x31   :  { %353 = vmatpush.msrb.mxu3 %v285_v6  ;;  %294 = vmatpush.msrb.mxu0 %v250_v7  ;;  %v267_v48 = vld [vmem:[#allocation5 + $0x168] sm:$0xff]  ;;  %v226_v49 = vld [vmem:[#allocation5 + $0x20] sm:$0xff]  ;;  %v264_v50 = vld [vmem:[#allocation5 + $0x150] sm:$0xff] }
  0x32   :  { %334 = vmatpush.msrb.mxu2 %v251_v8  ;;  %314 = vmatpush.msrb.mxu1 %v282_v9  ;;  %v227_v51 = vld [vmem:[#allocation5 + $0x28] sm:$0xff]  ;;  %v265_v52 = vld [vmem:[#allocation5 + $0x158] sm:$0xff]  ;;  %v224_v53 = vld [vmem:[#allocation5 + $0x10] sm:$0xff] }
  0x33   :  { %354 = vmatpush.msrb.mxu3 %v283_v10  ;;  %295 = vmatpush.msrb.mxu0 %v248_v11  ;;  %v262_v54 = vld [vmem:[#allocation5 + $0x140] sm:$0xff]  ;;  %v225_v55 = vld [vmem:[#allocation5 + $0x18] sm:$0xff]  ;;  %v263_v56 = vld [vmem:[#allocation5 + $0x148] sm:$0xff] }
  0x34   :  { %335 = vmatpush.msrb.mxu2 %v249_v12  ;;  %315 = vmatpush.msrb.mxu1 %v280_v13  ;;  %v222_v57 = vld [vmem:[#allocation5] sm:$0xff]  ;;  %v260_v58 = vld [vmem:[#allocation5 + $0x130] sm:$0xff]  ;;  %v223_v59 = vld [vmem:[#allocation5 + $0x8] sm:$0xff] }
  0x35   :  { %355 = vmatpush.msrb.mxu3 %v281_v14  ;;  %296 = vmatpush.msrb.mxu0 %v246_v15  ;;  %v261_v60 = vld [vmem:[#allocation5 + $0x138] sm:$0xff]  ;;  %v258_v61 = vld [vmem:[#allocation5 + $0x120] sm:$0xff]  ;;  %v259_v62 = vld [vmem:[#allocation5 + $0x128] sm:$0xff] }
  0x36   :  { %336 = vmatpush.msrb.mxu2 %v247_v16  ;;  %316 = vmatpush.msrb.mxu1 %v278_v17  ;;  %v256_v63 = vld [vmem:[#allocation5 + $0x110] sm:$0xff]  ;;  %v257_v0 = vld [vmem:[#allocation5 + $0x118] sm:$0xff]  ;;  %v254_v1 = vld [vmem:[#allocation5 + $0x100] sm:$0xff] }
  0x37   :  { %356 = vmatpush.msrb.mxu3 %v279_v18  ;;  %297 = vmatpush.msrb.mxu0 %v244_v19  ;;  %v255_v2 = vld [vmem:[#allocation5 + $0x108] sm:$0xff]  ;;  %v414_v3 = vld [vmem:[#allocation5 + $0x2f0] sm:$0xff]  ;;  %v415_v4 = vld [vmem:[#allocation5 + $0x2f8] sm:$0xff] }
  0x38   :  { %337 = vmatpush.msrb.mxu2 %v245_v20  ;;  %317 = vmatpush.msrb.mxu1 %v276_v26  ;;  %v412_v5 = vld [vmem:[#allocation5 + $0x2e0] sm:$0xff]  ;;  %v413_v6 = vld [vmem:[#allocation5 + $0x2e8] sm:$0xff]  ;;  %v410_v7 = vld [vmem:[#allocation5 + $0x2d0] sm:$0xff] }
  0x39   :  { %298 = vmatpush.msrb.mxu0 %v242_v21  ;;  %357 = vmatpush.msrb.mxu3 %v277_v28  ;;  %v411_v8 = vld [vmem:[#allocation5 + $0x2d8] sm:$0xff]  ;;  %v446_v9 = vld [vmem:[#allocation5 + $0x3f0] sm:$0xff]  ;;  %v121_v10 = vld [vmem:[%s1085_s3] sm:$0x3] }
  0x3a   :  { %338 = vmatpush.msrb.mxu2 %v243_v22  ;;  %318 = vmatpush.msrb.mxu1 %v274_v30  ;;  %v447_v11 = vld [vmem:[#allocation5 + $0x3f8] sm:$0xff]  ;;  %v444_v12 = vld [vmem:[#allocation5 + $0x3e0] sm:$0xff]  ;;  %v409_v14 = vld [vmem:[#allocation5 + $0x2c8] sm:$0xff]  ;;  %v128_v16 = vperm.slane %v121_v10, 0 }
  0x3b   :  { %299 = vmatpush.msrb.mxu0 %v240_v23  ;;  %358 = vmatpush.msrb.mxu3 %v275_v32  ;;  %v408_v13 = vld [vmem:[#allocation5 + $0x2c0] sm:$0xff]  ;;  %v445_v15 = vld [vmem:[#allocation5 + $0x3e8] sm:$0xff]  ;;  %v406_v17 = vld [vmem:[#allocation5 + $0x2b0] sm:$0xff]  ;;  %v129_v23 = vperm.slane %v121_v10, 1 }
  0x3c   :  { %339 = vmatpush.msrb.mxu2 %v241_v24  ;;  %319 = vmatpush.msrb.mxu1 %v272_v34  ;;  %v407_v18 = vld [vmem:[#allocation5 + $0x2b8] sm:$0xff] }
  0x3d   :  { %300 = vmatpush.msrb.mxu0 %v238_v25  ;;  %359 = vmatpush.msrb.mxu3 %v273_v36  ;;  %v404_v36 = vld [vmem:[#allocation5 + $0x2a0] sm:$0xff]  ;;  %v387_v10 = vld [vmem:[#allocation5 + $0x218] sm:$0xff] }
  0x3e   :  { %340 = vmatpush.msrb.mxu2 %v239_v27  ;;  %320 = vmatpush.msrb.mxu1 %v270_v38  ;;  %v405_v38 = vld [vmem:[#allocation5 + $0x2a8] sm:$0xff] }
  0x3f   :  { %301 = vmatpush.msrb.mxu0 %v236_v29  ;;  %360 = vmatpush.msrb.mxu3 %v271_v40  ;;  %v402_v40 = vld [vmem:[#allocation5 + $0x290] sm:$0xff] }
  0x40   :  { %341 = vmatpush.msrb.mxu2 %v237_v31  ;;  %321 = vmatpush.msrb.mxu1 %v268_v42  ;;  %v403_v42 = vld [vmem:[#allocation5 + $0x298] sm:$0xff] }
  0x41   :  { %302 = vmatpush.msrb.mxu0 %v234_v33  ;;  %361 = vmatpush.msrb.mxu3 %v269_v44  ;;  %v400_v44 = vld [vmem:[#allocation5 + $0x280] sm:$0xff] }
  0x42   :  { %342 = vmatpush.msrb.mxu2 %v235_v35  ;;  %322 = vmatpush.msrb.mxu1 %v266_v46  ;;  %v401_v46 = vld [vmem:[#allocation5 + $0x288] sm:$0xff] }
  0x43   :  { %303 = vmatpush.msrb.mxu0 %v232_v37  ;;  %362 = vmatpush.msrb.mxu3 %v267_v48  ;;  %v442_v37 = vld [vmem:[#allocation5 + $0x3d0] sm:$0xff] }
  0x44   :  { %343 = vmatpush.msrb.mxu2 %v233_v39  ;;  %323 = vmatpush.msrb.mxu1 %v264_v50  ;;  %v443_v39 = vld [vmem:[#allocation5 + $0x3d8] sm:$0xff]  ;;  %v398_v48 = vld [vmem:[#allocation5 + $0x270] sm:$0xff] }
  0x45   :  { %304 = vmatpush.msrb.mxu0 %v230_v41  ;;  %363 = vmatpush.msrb.mxu3 %v265_v52  ;;  %v440_v41 = vld [vmem:[#allocation5 + $0x3c0] sm:$0xff]  ;;  %v399_v50 = vld [vmem:[#allocation5 + $0x278] sm:$0xff] }
  0x46   :  { %344 = vmatpush.msrb.mxu2 %v231_v43  ;;  %324 = vmatpush.msrb.mxu1 %v262_v54  ;;  %v441_v43 = vld [vmem:[#allocation5 + $0x3c8] sm:$0xff]  ;;  %v396_v52 = vld [vmem:[#allocation5 + $0x260] sm:$0xff] }
  0x47   :  { %305 = vmatpush.msrb.mxu0 %v228_v45  ;;  %364 = vmatpush.msrb.mxu3 %v263_v56  ;;  %v438_v45 = vld [vmem:[#allocation5 + $0x3b0] sm:$0xff]  ;;  %v397_v54 = vld [vmem:[#allocation5 + $0x268] sm:$0xff] }
  0x48   :  { %345 = vmatpush.msrb.mxu2 %v229_v47  ;;  %325 = vmatpush.msrb.mxu1 %v260_v58  ;;  %v439_v47 = vld [vmem:[#allocation5 + $0x3b8] sm:$0xff]  ;;  %v394_v56 = vld [vmem:[#allocation5 + $0x250] sm:$0xff] }
  0x49   :  { %306 = vmatpush.msrb.mxu0 %v226_v49  ;;  %365 = vmatpush.msrb.mxu3 %v261_v60  ;;  %v436_v49 = vld [vmem:[#allocation5 + $0x3a0] sm:$0xff]  ;;  %v395_v58 = vld [vmem:[#allocation5 + $0x258] sm:$0xff] }
  0x4a   :  { %346 = vmatpush.msrb.mxu2 %v227_v51  ;;  %326 = vmatpush.msrb.mxu1 %v258_v61  ;;  %v437_v51 = vld [vmem:[#allocation5 + $0x3a8] sm:$0xff]  ;;  %v392_v60 = vld [vmem:[#allocation5 + $0x240] sm:$0xff]  ;;  %v430_v61 = vld [vmem:[#allocation5 + $0x370] sm:$0xff] }
  0x4b   :  { %307 = vmatpush.msrb.mxu0 %v224_v53  ;;  %366 = vmatpush.msrb.mxu3 %v259_v62  ;;  %v434_v53 = vld [vmem:[#allocation5 + $0x390] sm:$0xff]  ;;  %v393_v62 = vld [vmem:[#allocation5 + $0x248] sm:$0xff] }
  0x4c   :  { %347 = vmatpush.msrb.mxu2 %v225_v55  ;;  %327 = vmatpush.msrb.mxu1 %v256_v63  ;;  %v435_v55 = vld [vmem:[#allocation5 + $0x398] sm:$0xff] }
  0x4d   :  { %308 = vmatpush.msrb.mxu0 %v222_v57  ;;  %367 = vmatpush.msrb.mxu3 %v257_v0  ;;  %v432_v57 = vld [vmem:[#allocation5 + $0x380] sm:$0xff]  ;;  %v431_v63 = vld [vmem:[#allocation5 + $0x378] sm:$0xff]  ;;  %v390_v0 = vld [vmem:[#allocation5 + $0x230] sm:$0xff] }
  0x4e   :  { %348 = vmatpush.msrb.mxu2 %v223_v59  ;;  %328 = vmatpush.msrb.mxu1 %v254_v1  ;;  %v433_v59 = vld [vmem:[#allocation5 + $0x388] sm:$0xff]  ;;  %v428_v1 = vld [vmem:[#allocation5 + $0x360] sm:$0xff] }
  0x4f   :  { %368 = vmatpush.msrb.mxu3 %v255_v2  ;;  %455 = vmatpush.msra.mxu0 %v414_v3  ;;  %v391_v2 = vld [vmem:[#allocation5 + $0x238] sm:$0xff]  ;;  %v429_v3 = vld [vmem:[#allocation5 + $0x368] sm:$0xff] }
  0x50   :  { %495 = vmatpush.msra.mxu2 %v415_v4  ;;  %475 = vmatpush.msra.mxu1 %v446_v9  ;;  %v388_v4 = vld [vmem:[#allocation5 + $0x220] sm:$0xff] }
  0x51   :  { %456 = vmatpush.msra.mxu0 %v412_v5  ;;  %515 = vmatpush.msra.mxu3 %v447_v11  ;;  %v426_v5 = vld [vmem:[#allocation5 + $0x350] sm:$0xff]  ;;  %v424_v9 = vld [vmem:[#allocation5 + $0x340] sm:$0xff]  ;;  %v425_v11 = vld [vmem:[#allocation5 + $0x348] sm:$0xff] }
  0x52   :  { %496 = vmatpush.msra.mxu2 %v413_v6  ;;  %476 = vmatpush.msra.mxu1 %v444_v12  ;;  %v389_v6 = vld [vmem:[#allocation5 + $0x228] sm:$0xff]  ;;  %v384_v12 = vld [vmem:[#allocation5 + $0x200] sm:$0xff] }
  0x53   :  { %457 = vmatpush.msra.mxu0 %v410_v7  ;;  %516 = vmatpush.msra.mxu3 %v445_v15  ;;  %v427_v7 = vld [vmem:[#allocation5 + $0x358] sm:$0xff] }
  0x54   :  { %497 = vmatpush.msra.mxu2 %v411_v8  ;;  %477 = vmatpush.msra.mxu1 %v442_v37  ;;  %v386_v8 = vld [vmem:[#allocation5 + $0x210] sm:$0xff]  ;;  %v423_v15 = vld [vmem:[#allocation5 + $0x338] sm:$0xff] }
  0x55   :  { %458 = vmatpush.msra.mxu0 %v408_v13  ;;  %517 = vmatpush.msra.mxu3 %v443_v39  ;;  %v422_v13 = vld [vmem:[#allocation5 + $0x330] sm:$0xff]  ;;  %v569_v37 = vld [vmem:[#allocation5 + $0x4b8] sm:$0xff] }
  0x56   :  { %498 = vmatpush.msra.mxu2 %v409_v14  ;;  %478 = vmatpush.msra.mxu1 %v440_v41  ;;  %v385_v14 = vld [vmem:[#allocation5 + $0x208] sm:$0xff] }
  0x57   :  { %459 = vmatpush.msra.mxu0 %v406_v17  ;;  %518 = vmatpush.msra.mxu3 %v441_v43  ;;  %v421_v17 = vld [vmem:[#allocation5 + $0x328] sm:$0xff] }
  0x58   :  { %499 = vmatpush.msra.mxu2 %v407_v18  ;;  %479 = vmatpush.msra.mxu1 %v438_v45  ;;  %v418_v18 = vld [vmem:[#allocation5 + $0x310] sm:$0xff] }
  0x59   :  { %460 = vmatpush.msra.mxu0 %v404_v36  ;;  %519 = vmatpush.msra.mxu3 %v439_v47  ;;  %v568_v36 = vld [vmem:[#allocation5 + $0x4b0] sm:$0xff] }
  0x5a   :  { %500 = vmatpush.msra.mxu2 %v405_v38  ;;  %480 = vmatpush.msra.mxu1 %v436_v49 }
  0x5b   :  { %461 = vmatpush.msra.mxu0 %v402_v40  ;;  %520 = vmatpush.msra.mxu3 %v437_v51 }
  0x5c   :  { %501 = vmatpush.msra.mxu2 %v403_v42  ;;  %481 = vmatpush.msra.mxu1 %v434_v53 }
  0x5d   :  { %462 = vmatpush.msra.mxu0 %v400_v44  ;;  %521 = vmatpush.msra.mxu3 %v435_v55  ;;  %v566_v55 = vld [vmem:[#allocation5 + $0x4a0] sm:$0xff] }
  0x5e   :  { %502 = vmatpush.msra.mxu2 %v401_v46  ;;  %482 = vmatpush.msra.mxu1 %v432_v57  ;;  %v567_v57 = vld [vmem:[#allocation5 + $0x4a8] sm:$0xff] }
  0x5f   :  { %463 = vmatpush.msra.mxu0 %v398_v48  ;;  %522 = vmatpush.msra.mxu3 %v433_v59  ;;  %v564_v59 = vld [vmem:[#allocation5 + $0x490] sm:$0xff] }
  0x60   :  { %503 = vmatpush.msra.mxu2 %v399_v50  ;;  %483 = vmatpush.msra.mxu1 %v430_v61  ;;  %v565_v61 = vld [vmem:[#allocation5 + $0x498] sm:$0xff] }
  0x61   :  { %464 = vmatpush.msra.mxu0 %v396_v52  ;;  %523 = vmatpush.msra.mxu3 %v431_v63  ;;  %v562_v63 = vld [vmem:[#allocation5 + $0x480] sm:$0xff] }
  0x62   :  { %504 = vmatpush.msra.mxu2 %v397_v54  ;;  %484 = vmatpush.msra.mxu1 %v428_v1  ;;  %v563_v1 = vld [vmem:[#allocation5 + $0x488] sm:$0xff] }
  0x63   :  { %465 = vmatpush.msra.mxu0 %v394_v56  ;;  %524 = vmatpush.msra.mxu3 %v429_v3  ;;  %v604_v56 = vld [vmem:[#allocation5 + $0x5d0] sm:$0xff] }
  0x64   :  { %505 = vmatpush.msra.mxu2 %v395_v58  ;;  %485 = vmatpush.msra.mxu1 %v426_v5  ;;  %v605_v58 = vld [vmem:[#allocation5 + $0x5d8] sm:$0xff]  ;;  %v560_v3 = vld [vmem:[#allocation5 + $0x470] sm:$0xff] }
  0x65   :  { %466 = vmatpush.msra.mxu0 %v392_v60  ;;  %525 = vmatpush.msra.mxu3 %v427_v7  ;;  %v602_v60 = vld [vmem:[#allocation5 + $0x5c0] sm:$0xff]  ;;  %v561_v5 = vld [vmem:[#allocation5 + $0x478] sm:$0xff] }
  0x66   :  { %506 = vmatpush.msra.mxu2 %v393_v62  ;;  %486 = vmatpush.msra.mxu1 %v424_v9  ;;  %v603_v62 = vld [vmem:[#allocation5 + $0x5c8] sm:$0xff]  ;;  %v558_v7 = vld [vmem:[#allocation5 + $0x460] sm:$0xff] }
  0x67   :  { %467 = vmatpush.msra.mxu0 %v390_v0  ;;  %526 = vmatpush.msra.mxu3 %v425_v11  ;;  %v600_v0 = vld [vmem:[#allocation5 + $0x5b0] sm:$0xff]  ;;  %v559_v9 = vld [vmem:[#allocation5 + $0x468] sm:$0xff] }
  0x68   :  { %507 = vmatpush.msra.mxu2 %v391_v2  ;;  %487 = vmatpush.msra.mxu1 %v422_v13  ;;  %v601_v2 = vld [vmem:[#allocation5 + $0x5b8] sm:$0xff]  ;;  %v556_v11 = vld [vmem:[#allocation5 + $0x450] sm:$0xff] }
  0x69   :  { %468 = vmatpush.msra.mxu0 %v388_v4  ;;  %527 = vmatpush.msra.mxu3 %v423_v15  ;;  %v598_v4 = vld [vmem:[#allocation5 + $0x5a0] sm:$0xff]  ;;  %v557_v13 = vld [vmem:[#allocation5 + $0x458] sm:$0xff] }
  0x6a   :  { %508 = vmatpush.msra.mxu2 %v389_v6  ;;  %v599_v6 = vld [vmem:[#allocation5 + $0x5a8] sm:$0xff]  ;;  %v554_v15 = vld [vmem:[#allocation5 + $0x440] sm:$0xff] }
  0x6b   :  { %469 = vmatpush.msra.mxu0 %v386_v8  ;;  %528 = vmatpush.msra.mxu3 %v421_v17  ;;  %v596_v8 = vld [vmem:[#allocation5 + $0x590] sm:$0xff]  ;;  %v555_v17 = vld [vmem:[#allocation5 + $0x448] sm:$0xff] }
  0x6c   :  { %509 = vmatpush.msra.mxu2 %v387_v10  ;;  %v597_v10 = vld [vmem:[#allocation5 + $0x598] sm:$0xff] }
  0x6d   :  { %470 = vmatpush.msra.mxu0 %v384_v12  ;;  %v594_v12 = vld [vmem:[#allocation5 + $0x580] sm:$0xff] }
  0x6e   :  { %510 = vmatpush.msra.mxu2 %v385_v14  ;;  %v595_v14 = vld [vmem:[#allocation5 + $0x588] sm:$0xff] }
  0xa9   :  { %v149_v19 = vpop.f32.mrf.mxu0 }
  0xaa   :  { %v150_v20 = vadd.f32 %v149_v19, %v128_v16  ;;  %v420_v16 = vld [vmem:[#allocation5 + $0x320] sm:$0xff]  ;;  %v419_v19 = vld [vmem:[#allocation5 + $0x318] sm:$0xff] }
  0xab   :  { %v169_v21 = vpop.f32.mrf.mxu1  ;;  %488 = vmatpush.msra.mxu1 %v420_v16  ;;  %529 = vmatpush.msra.mxu3 %v419_v19  ;;  %v592_v16 = vld [vmem:[#allocation5 + $0x570] sm:$0xff] }
  0xac   :  { %v170_v22 = vadd.f32 %v169_v21, %v150_v20  ;;  %v416_v20 = vld [vmem:[#allocation5 + $0x300] sm:$0xff]  ;;  %v417_v21 = vld [vmem:[#allocation5 + $0x308] sm:$0xff]  ;;  %v552_v19 = vld [vmem:[#allocation5 + $0x430] sm:$0xff] }
  0xad   :  { %489 = vmatpush.msra.mxu1 %v418_v18  ;;  %530 = vmatpush.msra.mxu3 %v417_v21  ;;  %v593_v18 = vld [vmem:[#allocation5 + $0x578] sm:$0xff] }
  0xae   :  { %v214_v24 = vmul.f32 1.442695, %v170_v22  ;;  %vm212_vm0 = vcmp.gt.f32.partialorder %v170_v22, 0.0  ;;  %v553_v21 = vld [vmem:[#allocation5 + $0x438] sm:$0xff] }
  0xaf   :  { %490 = vmatpush.msra.mxu1 %v416_v20  ;;  %v590_v20 = vld [vmem:[#allocation5 + $0x560] sm:$0xff] }
  0xb0   :  { %v189_v25 = vpop.f32.mrf.mxu2  ;;  %821 = vpow2.f32 %v214_v24  ;;  %v574_v24 = vld [vmem:[#allocation5 + $0x4e0] sm:$0xff] }
  0xb1   :  { %v190_v26 = vadd.f32 %v189_v25, %v129_v23  ;;  %v577_v23 = vld [vmem:[#allocation5 + $0x4f8] sm:$0xff]  ;;  %v575_v25 = vld [vmem:[#allocation5 + $0x4e8] sm:$0xff] }
  0xb2   :  { %v209_v27 = vpop.f32.mrf.mxu3 }
  0xb3   :  { %v210_v28 = vadd.f32 %v209_v27, %v190_v26  ;;  %v572_v26 = vld [vmem:[#allocation5 + $0x4d0] sm:$0xff]  ;;  %v573_v27 = vld [vmem:[#allocation5 + $0x4d8] sm:$0xff] }
  0xb5   :  { %v216_v29 = vmul.f32 1.442695, %v210_v28  ;;  %vm213_vm1 = vcmp.gt.f32.partialorder %v210_v28, 0.0 }
  0xb6   :  { %v822_v30 = vpop.eup %821 }
  0xb7   :  { %823 = vpow2.f32 %v216_v29  ;;  %v805_v31 = vadd.f32 -1.0, %v822_v30  ;;  %v807_v29 = vld [vmem:[%s1085_s3 + $0x2] sm:$0x3]  ;;  %v609_v30 = vld [vmem:[#allocation5 + $0x5f8] sm:$0xff] }
  0xb8   :  { %v290_v42 = vperm.slane %v807_v29, 1 }
  0xb9   :  { %v220_v32 = vsel %vm212_vm0, %v170_v22, %v805_v31  ;;  %v576_v22 = vld [vmem:[#allocation5 + $0x4f0] sm:$0xff]  ;;  %v606_v31 = vld [vmem:[#allocation5 + $0x5e0] sm:$0xff] }
  0xba   :  { %309 = vmatmul.f32.vlgmr.msrb.gmra.mxu0 %v220_v32  ;;  %349 = vmatmul.f32.vlgmr.msrb.gmra.mxu2 %v220_v32  ;;  %v570_v32 = vld [vmem:[#allocation5 + $0x4c0] sm:$0xff] }
  0xbb   :  { %617 = vmatpush.msrb.mxu0 %v576_v22  ;;  %657 = vmatpush.msrb.mxu2 %v577_v23  ;;  %v591_v22 = vld [vmem:[#allocation5 + $0x568] sm:$0xff]  ;;  %v550_v23 = vld [vmem:[#allocation5 + $0x420] sm:$0xff] }
  0xbd   :  { %v824_v33 = vpop.eup %823  ;;  %618 = vmatpush.msrb.mxu0 %v574_v24  ;;  %658 = vmatpush.msrb.mxu2 %v575_v25  ;;  %v588_v24 = vld [vmem:[#allocation5 + $0x550] sm:$0xff]  ;;  %v551_v25 = vld [vmem:[#allocation5 + $0x428] sm:$0xff] }
  0xbe   :  { %v806_v34 = vadd.f32 -1.0, %v824_v33  ;;  %v571_v33 = vld [vmem:[#allocation5 + $0x4c8] sm:$0xff] }
  0xbf   :  { %619 = vmatpush.msrb.mxu0 %v572_v26  ;;  %659 = vmatpush.msrb.mxu2 %v573_v27  ;;  %v589_v26 = vld [vmem:[#allocation5 + $0x558] sm:$0xff]  ;;  %v548_v27 = vld [vmem:[#allocation5 + $0x410] sm:$0xff] }
  0xc0   :  { %v221_v35 = vsel %vm213_vm1, %v210_v28, %v806_v34  ;;  %v608_v28 = vld [vmem:[#allocation5 + $0x5f0] sm:$0xff]  ;;  %v607_v34 = vld [vmem:[#allocation5 + $0x5e8] sm:$0xff] }
  0xc1   :  { %329 = vmatmul.f32.vlgmr.msrb.gmra.mxu1 %v221_v35  ;;  %369 = vmatmul.f32.vlgmr.msrb.gmra.mxu3 %v221_v35  ;;  %v289_v35 = vperm.slane %v807_v29, 0  ;;  %v549_v29 = vld [vmem:[#allocation5 + $0x418] sm:$0xff] }
  0xc2   :  { %637 = vmatpush.msrb.mxu1 %v608_v28  ;;  %677 = vmatpush.msrb.mxu3 %v609_v30  ;;  %v586_v28 = vld [vmem:[#allocation5 + $0x540] sm:$0xff]  ;;  %v587_v30 = vld [vmem:[#allocation5 + $0x548] sm:$0xff] }
  0xc3   :  { %620 = vmatpush.msrb.mxu0 %v570_v32  ;;  %660 = vmatpush.msrb.mxu2 %v571_v33  ;;  %v584_v32 = vld [vmem:[#allocation5 + $0x530] sm:$0xff]  ;;  %v547_v33 = vld [vmem:[#allocation5 + $0x408] sm:$0xff] }
  0xc4   :  { %638 = vmatpush.msrb.mxu1 %v606_v31  ;;  %678 = vmatpush.msrb.mxu3 %v607_v34  ;;  %v546_v31 = vld [vmem:[#allocation5 + $0x400] sm:$0xff]  ;;  %v585_v34 = vld [vmem:[#allocation5 + $0x538] sm:$0xff] }
  0xc5   :  { %621 = vmatpush.msrb.mxu0 %v568_v36  ;;  %661 = vmatpush.msrb.mxu2 %v569_v37  ;;  %v583_v36 = vld [vmem:[#allocation5 + $0x528] sm:$0xff]  ;;  %v580_v37 = vld [vmem:[#allocation5 + $0x510] sm:$0xff] }
  0xc6   :  { %639 = vmatpush.msrb.mxu1 %v604_v56  ;;  %679 = vmatpush.msrb.mxu3 %v605_v58 }
  0xc7   :  { %622 = vmatpush.msrb.mxu0 %v566_v55  ;;  %662 = vmatpush.msrb.mxu2 %v567_v57 }
  0xc8   :  { %640 = vmatpush.msrb.mxu1 %v602_v60  ;;  %680 = vmatpush.msrb.mxu3 %v603_v62 }
  0xc9   :  { %623 = vmatpush.msrb.mxu0 %v564_v59  ;;  %663 = vmatpush.msrb.mxu2 %v565_v61 }
  0xca   :  { %641 = vmatpush.msrb.mxu1 %v600_v0  ;;  %681 = vmatpush.msrb.mxu3 %v601_v2 }
  0xcb   :  { %624 = vmatpush.msrb.mxu0 %v562_v63  ;;  %664 = vmatpush.msrb.mxu2 %v563_v1 }
  0xcc   :  { %642 = vmatpush.msrb.mxu1 %v598_v4  ;;  %682 = vmatpush.msrb.mxu3 %v599_v6  ;;  %v736_v4 = vld [vmem:[%s1086_s4 + $0xe8] sm:$0xff]  ;;  %v735_v6 = vld [vmem:[%s1086_s4 + $0xe0] sm:$0xff] }
  0xcd   :  { %625 = vmatpush.msrb.mxu0 %v560_v3  ;;  %665 = vmatpush.msrb.mxu2 %v561_v5  ;;  %v717_v3 = vld [vmem:[%s1086_s4 + $0x50] sm:$0xff]  ;;  %v716_v5 = vld [vmem:[%s1086_s4 + $0x48] sm:$0xff] }
  0xce   :  { %643 = vmatpush.msrb.mxu1 %v596_v8  ;;  %683 = vmatpush.msrb.mxu3 %v597_v10  ;;  %v734_v8 = vld [vmem:[%s1086_s4 + $0xd8] sm:$0xff]  ;;  %v733_v10 = vld [vmem:[%s1086_s4 + $0xd0] sm:$0xff] }
  0xcf   :  { %626 = vmatpush.msrb.mxu0 %v558_v7  ;;  %666 = vmatpush.msrb.mxu2 %v559_v9  ;;  %v715_v7 = vld [vmem:[%s1086_s4 + $0x40] sm:$0xff]  ;;  %v714_v9 = vld [vmem:[%s1086_s4 + $0x38] sm:$0xff] }
  0xd0   :  { %644 = vmatpush.msrb.mxu1 %v594_v12  ;;  %684 = vmatpush.msrb.mxu3 %v595_v14  ;;  %v732_v12 = vld [vmem:[%s1086_s4 + $0xc8] sm:$0xff]  ;;  %v731_v14 = vld [vmem:[%s1086_s4 + $0xc0] sm:$0xff] }
  0xd1   :  { %627 = vmatpush.msrb.mxu0 %v556_v11  ;;  %667 = vmatpush.msrb.mxu2 %v557_v13  ;;  %v713_v11 = vld [vmem:[%s1086_s4 + $0x30] sm:$0xff]  ;;  %v712_v13 = vld [vmem:[%s1086_s4 + $0x28] sm:$0xff] }
  0xd2   :  { %645 = vmatpush.msrb.mxu1 %v592_v16  ;;  %685 = vmatpush.msrb.mxu3 %v593_v18  ;;  %v730_v16 = vld [vmem:[%s1086_s4 + $0xb8] sm:$0xff]  ;;  %v729_v18 = vld [vmem:[%s1086_s4 + $0xb0] sm:$0xff] }
  0xd3   :  { %628 = vmatpush.msrb.mxu0 %v554_v15  ;;  %668 = vmatpush.msrb.mxu2 %v555_v17  ;;  %v711_v15 = vld [vmem:[%s1086_s4 + $0x20] sm:$0xff]  ;;  %v710_v17 = vld [vmem:[%s1086_s4 + $0x18] sm:$0xff] }
  0xd4   :  { %646 = vmatpush.msrb.mxu1 %v590_v20  ;;  %686 = vmatpush.msrb.mxu3 %v591_v22  ;;  %v728_v20 = vld [vmem:[%s1086_s4 + $0xa8] sm:$0xff]  ;;  %v727_v22 = vld [vmem:[%s1086_s4 + $0xa0] sm:$0xff] }
  0xd5   :  { %629 = vmatpush.msrb.mxu0 %v552_v19  ;;  %669 = vmatpush.msrb.mxu2 %v553_v21  ;;  %v709_v19 = vld [vmem:[%s1086_s4 + $0x10] sm:$0xff]  ;;  %v708_v21 = vld [vmem:[%s1086_s4 + $0x8] sm:$0xff] }
  0xd6   :  { %647 = vmatpush.msrb.mxu1 %v588_v24  ;;  %687 = vmatpush.msrb.mxu3 %v589_v26  ;;  %v726_v24 = vld [vmem:[%s1086_s4 + $0x98] sm:$0xff]  ;;  %v724_v26 = vld [vmem:[%s1086_s4 + $0x88] sm:$0xff] }
  0xd7   :  { %630 = vmatpush.msrb.mxu0 %v550_v23  ;;  %670 = vmatpush.msrb.mxu2 %v551_v25  ;;  %v707_v23 = vld [vmem:[%s1086_s4] sm:$0xff]  ;;  %v725_v25 = vld [vmem:[%s1086_s4 + $0x90] sm:$0xff] }
  0xd8   :  { %648 = vmatpush.msrb.mxu1 %v586_v28  ;;  %688 = vmatpush.msrb.mxu3 %v587_v30  ;;  %v813_v28 = vld [vmem:[%s1085_s3 + $0x6] sm:$0x3] }
  0xd9   :  { %631 = vmatpush.msrb.mxu0 %v548_v27  ;;  %671 = vmatpush.msrb.mxu2 %v549_v29  ;;  %v723_v27 = vld [vmem:[%s1086_s4 + $0x80] sm:$0xff]  ;;  %v613_v29 = vperm.slane %v813_v28, 0 }
  0xda   :  { %649 = vmatpush.msrb.mxu1 %v584_v32  ;;  %689 = vmatpush.msrb.mxu3 %v585_v34  ;;  %v614_v34 = vperm.slane %v813_v28, 1 }
  0xdb   :  { %632 = vmatpush.msrb.mxu0 %v546_v31  ;;  %672 = vmatpush.msrb.mxu2 %v547_v33 }
  0xdc   :  { %690 = vmatpush.msrb.mxu3 %v583_v36 }
 0x137   :  { %v310_v38 = vpop.f32.mrf.mxu0 }
 0x138   :  { %v311_v39 = vadd.f32 %v310_v38, %v289_v35  ;;  %v582_v35 = vld [vmem:[#allocation5 + $0x520] sm:$0xff]  ;;  %v581_v38 = vld [vmem:[#allocation5 + $0x518] sm:$0xff] }
 0x139   :  { %650 = vmatpush.msrb.mxu1 %v582_v35  ;;  %691 = vmatpush.msrb.mxu3 %v581_v38 }
 0x13b   :  { %651 = vmatpush.msrb.mxu1 %v580_v37 }
 0x13d   :  { %v350_v43 = vpop.f32.mrf.mxu2 }
 0x13e   :  { %v330_v40 = vpop.f32.mrf.mxu1  ;;  %v351_v45 = vadd.f32 %v350_v43, %v290_v42  ;;  %v721_v42 = vld [vmem:[%s1086_s4 + $0x70] sm:$0xff]  ;;  %v738_v43 = vld [vmem:[%s1086_s4 + $0xf8] sm:$0xff] }
 0x13f   :  { %v331_v41 = vadd.f32 %v330_v40, %v311_v39  ;;  %v578_v39 = vld [vmem:[#allocation5 + $0x500] sm:$0xff]  ;;  %v579_v40 = vld [vmem:[#allocation5 + $0x508] sm:$0xff] }
 0x140   :  { %652 = vmatpush.msrb.mxu1 %v578_v39  ;;  %692 = vmatpush.msrb.mxu3 %v579_v40 }
 0x141   :  { %v375_v44 = vmul.f32 1.442695, %v331_v41  ;;  %vm373_vm2 = vcmp.gt.f32.partialorder %v331_v41, 0.0 }
 0x143   :  { %825 = vpow2.f32 %v375_v44  ;;  %v720_v44 = vld [vmem:[%s1086_s4 + $0x68] sm:$0xff] }
 0x144   :  { %v370_v46 = vpop.f32.mrf.mxu3 }
 0x145   :  { %v371_v47 = vadd.f32 %v370_v46, %v351_v45  ;;  %v737_v45 = vld [vmem:[%s1086_s4 + $0xf0] sm:$0xff]  ;;  %v810_v46 = vld [vmem:[%s1085_s3 + $0x4] sm:$0x3] }
 0x147   :  { %v377_v48 = vmul.f32 1.442695, %v371_v47  ;;  %vm374_vm3 = vcmp.gt.f32.partialorder %v371_v47, 0.0 }
 0x149   :  { %v826_v49 = vpop.eup %825  ;;  %827 = vpow2.f32 %v377_v48  ;;  %v451_v48 = vperm.slane %v810_v46, 0 }
 0x14a   :  { %v808_v50 = vadd.f32 -1.0, %v826_v49  ;;  %v718_v49 = vld [vmem:[%s1086_s4 + $0x58] sm:$0xff] }
 0x14c   :  { %v381_v51 = vsel %vm373_vm2, %v331_v41, %v808_v50  ;;  %v722_v41 = vld [vmem:[%s1086_s4 + $0x78] sm:$0xff] }
 0x14d   :  { %471 = vmatmul.f32.vlgmr.msra.gmra.mxu0 %v381_v51  ;;  %511 = vmatmul.f32.vlgmr.msra.gmra.mxu2 %v381_v51 }
 0x14e   :  { %740 = vmatpush.msra.mxu0 %v722_v41 }
 0x14f   :  { %v828_v52 = vpop.eup %827 }
 0x150   :  { %v809_v53 = vadd.f32 -1.0, %v828_v52  ;;  %741 = vmatpush.msra.mxu0 %v721_v42 }
 0x152   :  { %v382_v54 = vsel %vm374_vm3, %v371_v47, %v809_v53  ;;  %v719_v47 = vld [vmem:[%s1086_s4 + $0x60] sm:$0xff]  ;;  %742 = vmatpush.msra.mxu0 %v720_v44 }
 0x153   :  { %491 = vmatmul.f32.vlgmr.msra.gmra.mxu1 %v382_v54  ;;  %531 = vmatmul.f32.vlgmr.msra.gmra.mxu3 %v382_v54  ;;  %v452_v54 = vperm.slane %v810_v46, 1 }
 0x154   :  { %760 = vmatpush.msra.mxu1 %v738_v43  ;;  %743 = vmatpush.msra.mxu0 %v719_v47  ;;  %v739_v47 = vld [vmem:[%s1087_s5] sm:$0x1] }
 0x156   :  { %761 = vmatpush.msra.mxu1 %v737_v45  ;;  %744 = vmatpush.msra.mxu0 %v718_v49 }
 0x158   :  { %745 = vmatpush.msra.mxu0 %v717_v3  ;;  %762 = vmatpush.msra.mxu1 %v736_v4 }
 0x15a   :  { %746 = vmatpush.msra.mxu0 %v716_v5  ;;  %763 = vmatpush.msra.mxu1 %v735_v6 }
 0x15c   :  { %747 = vmatpush.msra.mxu0 %v715_v7  ;;  %764 = vmatpush.msra.mxu1 %v734_v8 }
 0x15e   :  { %748 = vmatpush.msra.mxu0 %v714_v9  ;;  %765 = vmatpush.msra.mxu1 %v733_v10 }
 0x160   :  { %749 = vmatpush.msra.mxu0 %v713_v11  ;;  %766 = vmatpush.msra.mxu1 %v732_v12 }
 0x162   :  { %750 = vmatpush.msra.mxu0 %v712_v13  ;;  %767 = vmatpush.msra.mxu1 %v731_v14 }
 0x164   :  { %751 = vmatpush.msra.mxu0 %v711_v15  ;;  %768 = vmatpush.msra.mxu1 %v730_v16 }
 0x166   :  { %752 = vmatpush.msra.mxu0 %v710_v17  ;;  %769 = vmatpush.msra.mxu1 %v729_v18 }
 0x168   :  { %753 = vmatpush.msra.mxu0 %v709_v19  ;;  %770 = vmatpush.msra.mxu1 %v728_v20 }
 0x16a   :  { %754 = vmatpush.msra.mxu0 %v708_v21  ;;  %771 = vmatpush.msra.mxu1 %v727_v22 }
 0x16c   :  { %755 = vmatpush.msra.mxu0 %v707_v23  ;;  %772 = vmatpush.msra.mxu1 %v726_v24 }
 0x16e   :  { %773 = vmatpush.msra.mxu1 %v725_v25 }
 0x170   :  { %774 = vmatpush.msra.mxu1 %v724_v26 }
 0x172   :  { %775 = vmatpush.msra.mxu1 %v723_v27 }
 0x1ca   :  { %v472_v50 = vpop.f32.mrf.mxu0 }
 0x1cb   :  { %v473_v51 = vadd.f32 %v472_v50, %v451_v48 }
 0x1d0   :  { %v492_v52 = vpop.f32.mrf.mxu1  ;;  %v512_v55 = vpop.f32.mrf.mxu2 }
 0x1d1   :  { %v493_v53 = vadd.f32 %v492_v52, %v473_v51  ;;  %v513_v57 = vadd.f32 %v512_v55, %v452_v54 }
 0x1d3   :  { %v537_v56 = vmul.f32 1.442695, %v493_v53  ;;  %vm535_vm4 = vcmp.gt.f32.partialorder %v493_v53, 0.0 }
 0x1d5   :  { %829 = vpow2.f32 %v537_v56 }
 0x1d6   :  { %v532_v58 = vpop.f32.mrf.mxu3 }
 0x1d7   :  { %v533_v59 = vadd.f32 %v532_v58, %v513_v57 }
 0x1d9   :  { %v539_v60 = vmul.f32 1.442695, %v533_v59  ;;  %vm536_vm5 = vcmp.gt.f32.partialorder %v533_v59, 0.0 }
 0x1db   :  { %v830_v61 = vpop.eup %829  ;;  %831 = vpow2.f32 %v539_v60 }
 0x1dc   :  { %v811_v62 = vadd.f32 -1.0, %v830_v61 }
 0x1de   :  { %v543_v63 = vsel %vm535_vm4, %v493_v53, %v811_v62 }
 0x1df   :  { %633 = vmatmul.f32.vlgmr.msrb.gmra.mxu0 %v543_v63  ;;  %673 = vmatmul.f32.vlgmr.msrb.gmra.mxu2 %v543_v63 }
 0x1e1   :  { %v832_v0 = vpop.eup %831 }
 0x1e2   :  { %v812_v1 = vadd.f32 -1.0, %v832_v0 }
 0x1e4   :  { %v544_v2 = vsel %vm536_vm5, %v533_v59, %v812_v1 }
 0x1e5   :  { %653 = vmatmul.f32.vlgmr.msrb.gmra.mxu1 %v544_v2  ;;  %693 = vmatmul.f32.vlgmr.msrb.gmra.mxu3 %v544_v2 }
 0x25c   :  { %v634_v30 = vpop.f32.mrf.mxu0 }
 0x25d   :  { %v635_v31 = vadd.f32 %v634_v30, %v613_v29 }
 0x262   :  { %v654_v32 = vpop.f32.mrf.mxu1  ;;  %v674_v35 = vpop.f32.mrf.mxu2 }
 0x263   :  { %v655_v33 = vadd.f32 %v654_v32, %v635_v31  ;;  %v675_v37 = vadd.f32 %v674_v35, %v614_v34 }
 0x265   :  { %v699_v36 = vmul.f32 1.442695, %v655_v33  ;;  %vm697_vm6 = vcmp.gt.f32.partialorder %v655_v33, 0.0 }
 0x267   :  { %833 = vpow2.f32 %v699_v36 }
 0x268   :  { %v694_v38 = vpop.f32.mrf.mxu3 }
 0x269   :  { %v695_v39 = vadd.f32 %v694_v38, %v675_v37 }
 0x26b   :  { %v701_v40 = vmul.f32 1.442695, %v695_v39  ;;  %vm698_vm7 = vcmp.gt.f32.partialorder %v695_v39, 0.0 }
 0x26d   :  { %v834_v41 = vpop.eup %833  ;;  %835 = vpow2.f32 %v701_v40 }
 0x26e   :  { %v814_v42 = vadd.f32 -1.0, %v834_v41 }
 0x270   :  { %v705_v43 = vsel %vm697_vm6, %v655_v33, %v814_v42 }
 0x271   :  { %756 = vmatmul.f32.vlgmr.msra.gmra.mxu0 %v705_v43 }
 0x273   :  { %v836_v44 = vpop.eup %835 }
 0x274   :  { %v815_v45 = vadd.f32 -1.0, %v836_v44 }
 0x276   :  { %v706_v46 = vsel %vm698_vm7, %v695_v39, %v815_v45 }
 0x277   :  { %776 = vmatmul.f32.vlgmr.msra.gmra.mxu1 %v706_v46 }
 0x2ee   :  { %v757_v48 = vpop.f32.mrf.mxu0 }
 0x2ef   :  { %v758_v49 = vadd.f32 %v757_v48, %v739_v47 }
 0x2f4   :  { %v777_v50 = vpop.f32.mrf.mxu1 }
 0x2f5   :  { %v778_v51 = vadd.f32 %v777_v50, %v758_v49 }
 0x2f7   :  { %v780_v52 = vsub.f32 0.0, %v778_v51 }
 0x2f9   :  { %v781_v53 = vmul.f32 1.442695, %v780_v52 }
 0x2fb   :  { %837 = vpow2.f32 %v781_v53 }
 0x301   :  { %v838_v54 = vpop.eup %837 }
 0x302   :  { %v783_v55 = vadd.f32 1.0, %v838_v54 }
 0x304   :  { %839 = vrcp.f32 %v783_v55 }
 0x30a   :  { %v840_v56 = vpop.eup %839 }
 0x30b   :  { %786 = vst.msk [vmem:[#allocation7] sm:$0x1] %vm785_vm8, %v840_v56 }
 0x30c   :  { %797 = dma.vmem_to_hbm [thread:$0]  %s793_s27, 16, %s795_s30, [#allocation4]  }
 0x30d   :  { %917 = dma.done.wait [#allocation4], 16  }
 0x30e   :  { %918 = vsyncadd [#allocation4], 4294967280 }
 0x30f   :  { %802 = vsyncpa [#allocation3], 1 }
 0x310   :  { %803 = vsyncpa [#allocation6], 1 }
 0x311   :  { %804 = vsyncpa [#allocation4], 1 }

</bundles_post_ra>
